<compile_context>
chip_gen: v6e
topology: v6e:2x2x1
jax: 0.10.0
libtpu: 0.0.40
codegen_flags: <defaults>
</compile_context>

<pallas_src>
import functools

import jax
import jax.numpy as jnp
from jax.experimental import pallas as pl
from jax.experimental.pallas import tpu as pltpu


def _round_up(x, m):
    return ((x + m - 1) // m) * m


def _focal_loss_kernel(logits_ref, targets_ref, weight_ref, out_ref, acc_ref, *,
                       gamma, ignore_index, hw, tile_p):
    p_idx = pl.program_id(1)

    # reset the per-image accumulators at the first pixel tile
    @pl.when(p_idx == 0)
    def _():
        acc_ref[0] = 0.0
        acc_ref[1] = 0.0

    x = logits_ref[0].astype(jnp.float32)               # (C, TILE_P)
    t = targets_ref[0]                                  # (1, TILE_P) int32
    C = x.shape[0]

    # mask lanes past the true pixel count (ragged last tile reads padding)
    pix = p_idx * tile_p + jax.lax.broadcasted_iota(jnp.int32, (1, tile_p), 1)
    valid = (t != ignore_index) & (pix < hw)            # (1, TILE_P)

    # numerically-stable log-sum-exp over classes
    m = jnp.max(x, axis=0, keepdims=True)               # (1, TILE_P)
    lse = m + jnp.log(jnp.sum(jnp.exp(x - m), axis=0, keepdims=True))

    # one-hot select of the target logit (avoids gather on TPU)
    cls_ids = jax.lax.broadcasted_iota(jnp.int32, (C, tile_p), 0)
    onehot = (cls_ids == t).astype(jnp.float32)          # (C, TILE_P)
    tgt_logit = jnp.sum(onehot * x, axis=0, keepdims=True)

    cce = jnp.where(valid, lse - tgt_logit, 0.0)         # masked -> 0 loss
    cce = jnp.maximum(cce, 0.0)                          # guard fp round-off

    # focal factor; integer gamma -> pure VPU multiply chain (no pow=exp+log).
    # (1 - exp(-cce)) matches the PyTorch reference exactly; expm1 would only
    # change accuracy near cce ~ 0 where the contribution is negligible.
    e = 1.0 - jnp.exp(-cce)
    gi = int(gamma)
    if float(gamma) == float(gi) and gi >= 0:
        f = jnp.ones_like(e)
        for _ in range(gi):
            f = f * e
    else:
        f = jnp.power(e, gamma)

    # per-pixel class weight (ones when no weight is given); doubles as the
    # valid-pixel mask for the weighted-mean denominator
    w_t = jnp.sum(onehot * weight_ref[...], axis=0, keepdims=True)
    w_t = jnp.where(valid, w_t, 0.0)

    acc_ref[0] += jnp.sum(f * cce * w_t)
    acc_ref[1] += jnp.sum(w_t)

    # flush per-image partial sums (lane 0: loss sum, lane 1: weight sum)
    @pl.when(p_idx == pl.num_programs(1) - 1)
    def _():
        lane = jax.lax.broadcasted_iota(jnp.int32, (1, 1, 128), 2)
        out_ref[...] = jnp.where(lane == 0, acc_ref[0],
                                 jnp.where(lane == 1, acc_ref[1], 0.0))


def focal_loss(inputs, targets, *, gamma, weight=None, ignore_index=-100,
               reduction='mean', tile_p=8192):
    """inputs: (N, C, H, W) float (any dtype), targets: (N, H, W) int -> scalar."""
    if reduction not in ('mean', 'sum'):
        # TODO(synk): reduction='none' (per-pixel output) not wired through the
        # partial-sum output path; it would need a (1, 1, TILE_P) VMEM out_spec.
        raise ValueError("only 'mean' and 'sum' reductions are implemented")

    N, C, H, W = inputs.shape
    HW = H * W
    logits = inputs.reshape(N, C, HW)                    # free reshape, native dtype
    tgt = targets.reshape(N, 1, HW).astype(jnp.int32)
    use_weight = weight is not None
    w = (jnp.asarray(weight, jnp.float32) if use_weight
         else jnp.ones((C,), jnp.float32)).reshape(C, 1)

    # lane-aligned pixel tile, capped so a small image is a single tile
    tile_p = max(128, _round_up(min(int(tile_p), HW), 128))
    num_p_tiles = pl.cdiv(HW, tile_p)

    kernel = functools.partial(
        _focal_loss_kernel,
        gamma=float(gamma),
        ignore_index=int(ignore_index),
        hw=int(HW),
        tile_p=int(tile_p),
    )

    cost = pl.CostEstimate(
        flops=int(N * HW * (8 * C + 16)),
        transcendentals=int(N * HW * (C + 2)),
        bytes_accessed=int(logits.size * logits.dtype.itemsize
                           + tgt.size * tgt.dtype.itemsize
                           + N * 128 * 4 + C * 4),
    )

    partials = pl.pallas_call(
        kernel,
        out_shape=jax.ShapeDtypeStruct((N, 1, 128), jnp.float32),
        grid_spec=pltpu.PrefetchScalarGridSpec(
            num_scalar_prefetch=0,
            grid=(N, num_p_tiles),
            in_specs=[
                pl.BlockSpec((1, C, tile_p), lambda n, p: (n, 0, p)),   # logits
                pl.BlockSpec((1, 1, tile_p), lambda n, p: (n, 0, p)),   # targets
                pl.BlockSpec((C, 1), lambda n, p: (0, 0)),              # class weights
            ],
            out_specs=pl.BlockSpec((1, 1, 128), lambda n, p: (n, 0, 0)),
            scratch_shapes=[pltpu.SMEM((2,), jnp.float32)],
        ),
        compiler_params=pltpu.CompilerParams(
            dimension_semantics=("parallel", "arbitrary")),
        cost_estimate=cost,
    )(logits, tgt, w)

    loss_sum = jnp.sum(partials[:, 0, 0])
    if reduction == 'sum':
        return loss_sum
    if use_weight:
        return loss_sum / jnp.sum(partials[:, 0, 1])
    return loss_sum / float(N * HW)


def _reference(inputs, targets, gamma, weight, ignore_index, reduction):
    """Pure-JAX re-implementation of the PyTorch forward (for validation)."""
    C = inputs.shape[1]
    logp = jax.nn.log_softmax(inputs.astype(jnp.float32), axis=1)
    t_safe = jnp.clip(targets, 0, C - 1)
    nll = -jnp.take_along_axis(logp, t_safe[:, None], axis=1)[:, 0]
    valid = targets != ignore_index
    cce = jnp.where(valid, nll, 0.0)
    cce = jnp.maximum(cce, 0.0)
    focal = jnp.power(1.0 - jnp.exp(-cce), gamma) * cce
    if weight is not None:
        w_t = weight[t_safe] * valid.astype(jnp.float32)
        focal = w_t * focal
    if reduction == 'mean':
        return focal.mean() if weight is None else focal.sum() / w_t.sum()
    elif reduction == 'sum':
        return focal.sum()
    return focal


if __name__ == "__main__":
    key = jax.random.PRNGKey(0)
    N, C, H, W = 2, 4, 16, 16
    k1, k2, k3, k4 = jax.random.split(key, 4)
    x = jax.random.normal(k1, (N, C, H, W), jnp.float32)
    t = jax.random.randint(k2, (N, H, W), 0, C).astype(jnp.int32)
    t_ign = t.at[0, 0, :4].set(-100)          # sprinkle ignore_index pixels

    gamma = 2.0
    class_weight = jnp.array([1.0, 2.0, 0.5, 1.5], jnp.float32)

    # case 1: no class weights, 'mean' reduction, with ignore_index pixels
    out1 = focal_loss(x, t_ign, gamma=gamma, weight=None, reduction='mean')
    ref1 = _reference(x, t_ign, gamma, None, -100, 'mean')

    # case 2: class weights, 'mean' reduction (all targets valid)
    out2 = focal_loss(x, t, gamma=gamma, weight=class_weight, reduction='mean')
    ref2 = _reference(x, t, gamma, class_weight, -100, 'mean')

    # case 3: 'sum' reduction
    out3 = focal_loss(x, t_ign, gamma=gamma, weight=None, reduction='sum')
    ref3 = _reference(x, t_ign, gamma, None, -100, 'sum')

    # case 4: ragged pixel tiling (HW=320 with TILE_P=256 -> masked last tile)
    H2, W2 = 16, 20
    x4 = jax.random.normal(k3, (N, C, H2, W2), jnp.float32)
    t4 = jax.random.randint(k4, (N, H2, W2), 0, C).astype(jnp.int32)
    t4 = t4.at[1, 3, :5].set(-100)
    out4 = focal_loss(x4, t4, gamma=gamma, weight=None, reduction='mean',
                      tile_p=256)
    ref4 = _reference(x4, t4, gamma, None, -100, 'mean')

    # case 5: bf16 logits fed in native dtype (upcast happens in-kernel)
    x_bf = x.astype(jnp.bfloat16)
    out5 = focal_loss(x_bf, t_ign, gamma=gamma, weight=None, reduction='mean')
    ref5 = _reference(x_bf.astype(jnp.float32), t_ign, gamma, None, -100, 'mean')

    jax.block_until_ready((out1, out2, out3, out4, out5))
    assert jnp.allclose(out1, ref1, atol=1e-5, rtol=1e-5), (out1, ref1)
    assert jnp.allclose(out2, ref2, atol=1e-5, rtol=1e-5), (out2, ref2)
    assert jnp.allclose(out3, ref3, atol=1e-4, rtol=1e-5), (out3, ref3)
    assert jnp.allclose(out4, ref4, atol=1e-5, rtol=1e-5), (out4, ref4)
    assert jnp.allclose(out5, ref5, atol=1e-5, rtol=1e-5), (out5, ref5)
    print("KERNEL_OK")
</pallas_src>

<mosaic_0001>
module attributes {stable_mosaic.version = 11 : i64} {
  func.func @_focal_loss_kernel(%arg0: i32, %arg1: i32, %arg2: memref<1x4x256xf32, #tpu.memory_space<vmem>>, %arg3: memref<1x1x256xi32, #tpu.memory_space<vmem>>, %arg4: memref<4x1xf32, #tpu.memory_space<vmem>>, %arg5: memref<1x1x128xf32, #tpu.memory_space<vmem>>, %arg6: memref<2xf32, #tpu.memory_space<smem>>) attributes {dimension_semantics = [#tpu.dimension_semantics<parallel>, #tpu.dimension_semantics<arbitrary>], iteration_bounds = array<i64: 2, 1>, scalar_prefetch = 0 : i64, scratch_operands = 1 : i64, tpu.core_type = #tpu.core_type<tc>, window_params = [{transform_indices = @transform_0, window_bounds = array<i64: 1, 4, 256>}, {transform_indices = @transform_1, window_bounds = array<i64: 1, 1, 256>}, {pipeline_mode = #tpu.pipeline_mode<synchronous>, transform_indices = @transform_2, window_bounds = array<i64: 4, 1>}, {transform_indices = @transform_3, window_bounds = array<i64: 1, 1, 128>}]} {
    %c0_i32 = arith.constant 0 : i32
    %0 = arith.cmpi eq, %arg1, %c0_i32 : i32
    %1 = arith.extui %0 : i1 to i32
    %c0_i32_0 = arith.constant 0 : i32
    %2 = arith.cmpi ne, %1, %c0_i32_0 : i32
    scf.if %2 {
      %cst_25 = arith.constant 0.000000e+00 : f32
      %c0_26 = arith.constant 0 : index
      %72 = memref.load %arg6[%c0_26] : memref<2xf32, #tpu.memory_space<smem>>
      memref.store %cst_25, %arg6[%c0_26] : memref<2xf32, #tpu.memory_space<smem>>
      %cst_27 = arith.constant 0.000000e+00 : f32
      %c1_28 = arith.constant 1 : index
      %73 = memref.load %arg6[%c1_28] : memref<2xf32, #tpu.memory_space<smem>>
      memref.store %cst_27, %arg6[%c1_28] : memref<2xf32, #tpu.memory_space<smem>>
    } else {
    }
    %c0 = arith.constant 0 : index
    %c0_1 = arith.constant 0 : index
    %c0_2 = arith.constant 0 : index
    %3 = vector.load %arg2[%c0, %c0_1, %c0_2] : memref<1x4x256xf32, #tpu.memory_space<vmem>>, vector<1x4x256xf32>
    %4 = vector.shape_cast %3 : vector<1x4x256xf32> to vector<4x256xf32>
    %c0_3 = arith.constant 0 : index
    %c0_4 = arith.constant 0 : index
    %c0_5 = arith.constant 0 : index
    %5 = vector.load %arg3[%c0_3, %c0_4, %c0_5] : memref<1x1x256xi32, #tpu.memory_space<vmem>>, vector<1x1x256xi32>
    %6 = vector.shape_cast %5 : vector<1x1x256xi32> to vector<1x256xi32>
    %c256_i32 = arith.constant 256 : i32
    %7 = arith.muli %arg1, %c256_i32 : i32
    %8 = tpu.iota {dimensions = array<i32: 1>} : vector<1x256xi32>
    %9 = vector.broadcast %7 : i32 to vector<1x256xi32>
    %10 = arith.addi %9, %8 : vector<1x256xi32>
    %c-100_i32 = arith.constant -100 : i32
    %11 = vector.broadcast %c-100_i32 : i32 to vector<1x256xi32>
    %12 = arith.cmpi ne, %6, %11 : vector<1x256xi32>
    %c256_i32_6 = arith.constant 256 : i32
    %13 = vector.broadcast %c256_i32_6 : i32 to vector<1x256xi32>
    %14 = arith.cmpi slt, %10, %13 : vector<1x256xi32>
    %15 = arith.andi %12, %14 : vector<1x256xi1>
    %cst = arith.constant dense<0xFF800000> : vector<256xf32>
    %16 = vector.multi_reduction <maximumf>, %4, %cst [0] : vector<4x256xf32> to vector<256xf32>
    %17 = vector.shape_cast %16 : vector<256xf32> to vector<1x256xf32>
    %18 = vector.broadcast %17 : vector<1x256xf32> to vector<4x256xf32>
    %19 = arith.subf %4, %18 : vector<4x256xf32>
    %20 = math.exp %19 : vector<4x256xf32>
    %cst_7 = arith.constant dense<0.000000e+00> : vector<256xf32>
    %21 = vector.multi_reduction <add>, %20, %cst_7 [0] : vector<4x256xf32> to vector<256xf32>
    %22 = vector.shape_cast %21 : vector<256xf32> to vector<1x256xf32>
    %23 = math.log %22 : vector<1x256xf32>
    %24 = arith.addf %17, %23 : vector<1x256xf32>
    %25 = tpu.iota {dimensions = array<i32: 0>} : vector<4x256xi32>
    %26 = vector.broadcast %6 : vector<1x256xi32> to vector<4x256xi32>
    %27 = arith.cmpi eq, %25, %26 : vector<4x256xi32>
    %28 = arith.extui %27 : vector<4x256xi1> to vector<4x256xi32>
    %29 = arith.sitofp %28 : vector<4x256xi32> to vector<4x256xf32>
    %30 = arith.mulf %29, %4 : vector<4x256xf32>
    %cst_8 = arith.constant dense<0.000000e+00> : vector<256xf32>
    %31 = vector.multi_reduction <add>, %30, %cst_8 [0] : vector<4x256xf32> to vector<256xf32>
    %32 = vector.shape_cast %31 : vector<256xf32> to vector<1x256xf32>
    %33 = arith.subf %24, %32 : vector<1x256xf32>
    %cst_9 = arith.constant 0.000000e+00 : f32
    %34 = vector.broadcast %cst_9 : f32 to vector<1x256xf32>
    %35 = arith.select %15, %33, %34 : vector<1x256xi1>, vector<1x256xf32>
    %cst_10 = arith.constant 0.000000e+00 : f32
    %36 = vector.broadcast %cst_10 : f32 to vector<1x256xf32>
    %37 = arith.maximumf %35, %36 : vector<1x256xf32>
    %cst_11 = arith.constant 0.000000e+00 : f32
    %38 = vector.broadcast %cst_11 : f32 to vector<1x256xf32>
    %39 = arith.subf %38, %37 : vector<1x256xf32>
    %40 = math.exp %39 : vector<1x256xf32>
    %cst_12 = arith.constant 1.000000e+00 : f32
    %41 = vector.broadcast %cst_12 : f32 to vector<1x256xf32>
    %42 = arith.subf %41, %40 : vector<1x256xf32>
    %cst_13 = arith.constant 1.000000e+00 : f32
    %43 = vector.broadcast %cst_13 : f32 to vector<1x256xf32>
    %44 = arith.mulf %43, %42 : vector<1x256xf32>
    %45 = arith.mulf %44, %42 : vector<1x256xf32>
    %c0_14 = arith.constant 0 : index
    %c0_15 = arith.constant 0 : index
    %46 = vector.load %arg4[%c0_14, %c0_15] : memref<4x1xf32, #tpu.memory_space<vmem>>, vector<4x1xf32>
    %47 = vector.broadcast %46 : vector<4x1xf32> to vector<4x256xf32>
    %48 = arith.mulf %29, %47 : vector<4x256xf32>
    %cst_16 = arith.constant dense<0.000000e+00> : vector<256xf32>
    %49 = vector.multi_reduction <add>, %48, %cst_16 [0] : vector<4x256xf32> to vector<256xf32>
    %50 = vector.shape_cast %49 : vector<256xf32> to vector<1x256xf32>
    %cst_17 = arith.constant 0.000000e+00 : f32
    %51 = vector.broadcast %cst_17 : f32 to vector<1x256xf32>
    %52 = arith.select %15, %50, %51 : vector<1x256xi1>, vector<1x256xf32>
    %c0_18 = arith.constant 0 : index
    %53 = memref.load %arg6[%c0_18] : memref<2xf32, #tpu.memory_space<smem>>
    %54 = arith.mulf %45, %37 : vector<1x256xf32>
    %55 = arith.mulf %54, %52 : vector<1x256xf32>
    %56 = vector.shape_cast %55 : vector<1x256xf32> to vector<1x1x256xf32>
    %cst_19 = arith.constant dense<0.000000e+00> : vector<1xf32>
    %57 = vector.multi_reduction <add>, %56, %cst_19 [1, 2] : vector<1x1x256xf32> to vector<1xf32>
    %58 = vector.shape_cast %57 : vector<1xf32> to vector<1x1x1xf32>
    %59 = vector.extract %58[0, 0, 0] : f32 from vector<1x1x1xf32>
    %60 = arith.addf %53, %59 : f32
    %c0_20 = arith.constant 0 : index
    %61 = memref.load %arg6[%c0_20] : memref<2xf32, #tpu.memory_space<smem>>
    memref.store %60, %arg6[%c0_20] : memref<2xf32, #tpu.memory_space<smem>>
    %c1 = arith.constant 1 : index
    %62 = memref.load %arg6[%c1] : memref<2xf32, #tpu.memory_space<smem>>
    %63 = vector.shape_cast %52 : vector<1x256xf32> to vector<1x1x256xf32>
    %cst_21 = arith.constant dense<0.000000e+00> : vector<1xf32>
    %64 = vector.multi_reduction <add>, %63, %cst_21 [1, 2] : vector<1x1x256xf32> to vector<1xf32>
    %65 = vector.shape_cast %64 : vector<1xf32> to vector<1x1x1xf32>
    %66 = vector.extract %65[0, 0, 0] : f32 from vector<1x1x1xf32>
    %67 = arith.addf %62, %66 : f32
    %c1_22 = arith.constant 1 : index
    %68 = memref.load %arg6[%c1_22] : memref<2xf32, #tpu.memory_space<smem>>
    memref.store %67, %arg6[%c1_22] : memref<2xf32, #tpu.memory_space<smem>>
    %c0_i32_23 = arith.constant 0 : i32
    %69 = arith.cmpi eq, %arg1, %c0_i32_23 : i32
    %70 = arith.extui %69 : i1 to i32
    %c0_i32_24 = arith.constant 0 : i32
    %71 = arith.cmpi ne, %70, %c0_i32_24 : i32
    scf.if %71 {
      %72 = tpu.iota {dimensions = array<i32: 2>} : vector<1x1x128xi32>
      %c0_i32_25 = arith.constant 0 : i32
      %73 = vector.broadcast %c0_i32_25 : i32 to vector<1x1x128xi32>
      %74 = arith.cmpi eq, %72, %73 : vector<1x1x128xi32>
      %c0_26 = arith.constant 0 : index
      %75 = memref.load %arg6[%c0_26] : memref<2xf32, #tpu.memory_space<smem>>
      %c1_i32 = arith.constant 1 : i32
      %76 = vector.broadcast %c1_i32 : i32 to vector<1x1x128xi32>
      %77 = arith.cmpi eq, %72, %76 : vector<1x1x128xi32>
      %c1_27 = arith.constant 1 : index
      %78 = memref.load %arg6[%c1_27] : memref<2xf32, #tpu.memory_space<smem>>
      %cst_28 = arith.constant 0.000000e+00 : f32
      %79 = vector.broadcast %78 : f32 to vector<1x1x128xf32>
      %80 = vector.broadcast %cst_28 : f32 to vector<1x1x128xf32>
      %81 = arith.select %77, %79, %80 : vector<1x1x128xi1>, vector<1x1x128xf32>
      %82 = vector.broadcast %75 : f32 to vector<1x1x128xf32>
      %83 = arith.select %74, %82, %81 : vector<1x1x128xi1>, vector<1x1x128xf32>
      %c0_29 = arith.constant 0 : index
      %c0_30 = arith.constant 0 : index
      %c0_31 = arith.constant 0 : index
      %84 = vector.load %arg5[%c0_29, %c0_30, %c0_31] : memref<1x1x128xf32, #tpu.memory_space<vmem>>, vector<1x1x128xf32>
      tpu.vector_store %arg5[%c0_29, %c0_30, %c0_31], %83 {strides = array<i32>} : memref<1x1x128xf32, #tpu.memory_space<vmem>>, vector<1x1x128xf32>,
    } else {
    }
    return
  }
  func.func @transform_0(%arg0: i32, %arg1: i32) -> (i32, i32, i32) {
    %c0_i32 = arith.constant 0 : i32
    %c0_i32_0 = arith.constant 0 : i32
    return %arg0, %c0_i32, %arg1 : i32, i32, i32
  }
  func.func @transform_1(%arg0: i32, %arg1: i32) -> (i32, i32, i32) {
    %c0_i32 = arith.constant 0 : i32
    %c0_i32_0 = arith.constant 0 : i32
    return %arg0, %c0_i32, %arg1 : i32, i32, i32
  }
  func.func @transform_2(%arg0: i32, %arg1: i32) -> (i32, i32) {
    %c0_i32 = arith.constant 0 : i32
    %c0_i32_0 = arith.constant 0 : i32
    %c0_i32_1 = arith.constant 0 : i32
    return %c0_i32, %c0_i32_0 : i32, i32
  }
  func.func @transform_3(%arg0: i32, %arg1: i32) -> (i32, i32, i32) {
    %c0_i32 = arith.constant 0 : i32
    %c0_i32_0 = arith.constant 0 : i32
    %c0_i32_1 = arith.constant 0 : i32
    return %arg0, %c0_i32, %c0_i32_0 : i32, i32, i32
  }
}

</mosaic_0001>

<bundles_post_ra>
// kernel: tpu_custom_call.1
= control target key start
LH: loop header
LB: loop body
LE: loop exit
PB: predicated region body
PF: predicated region fallthrough
CT: control target
= control target key end

     0   :  { %8 = vsyncpa [#allocation4], 0  ;;  %s1008_s0 = inlined_call_operand.hbm [shape: f32[2,4,256], index: 0, kind: input, shape index: {}]   ;;  %s1009_s1 = inlined_call_operand.vmem [shape: s32[2,1,256], index: 1, kind: input, shape index: {}]   ;;  %s1010_s2 = inlined_call_operand.vmem [shape: f32[4,1], index: 2, kind: input, shape index: {}]   ;;  %s1011_s3 = inlined_call_operand.hbm [shape: f32[2,1,128], index: 3, kind: output, shape index: {}]  }
   0x1   :  { %10 = vsyncpa [#allocation4 + $0x1], 0 }
   0x2   :  { %11 = vsyncpa [#allocation5], 0 }
   0x3   :  { %13 = vsyncpa [#allocation5 + $0x1], 0  ;;  %s831_s12 = smov 0   ;;  %s833_s13 = smov 0  }
   0x4   :  { %s835_s14 = smov 0   ;;  %s837_s15 = smov 0  }
   0x5   :  { %s839_s16 = smov 0   ;;  %s841_s17 = smov 0  }
   0x6 LB: > { %s597_s18 = sadd.s32 4294967295, %s803_s17   ;;  %s598_s19 = sadd.s32 4294967294, %s803_s17   ;;  %s803_s17 = sphi %s841_s17, %s19_s17   ;;  %s799_s16 = sphi %s839_s16, %s1025_s16   ;;  %s795_s15 = sphi %s837_s15, %s1024_s15   ;;  %s791_s14 = sphi %s835_s14, %s1023_s14   ;;  %s787_s13 = sphi %s833_s13, %s1022_s13   ;;  %s783_s12 = sphi %s831_s12, %s1021_s12  }
   0x7   : > { %s31_s20 = sadd.s32 1, %s799_s16  ;;  %s40_s21 = sadd.s32 1, %s791_s14 }
   0x8   : > { %p33_p0 = scmp.ge.s32.totalorder %s31_s20, 2  ;;  %p47_p1 = scmp.ne.s32.totalorder %s791_s14, %s787_s13 }
   0x9   : > { %p48_p2 = scmp.eq.s32.totalorder %s803_s17, 0  ;;  %p53_p3 = scmp.ne.s32.totalorder %s787_s13, %s783_s12 }
   0xa   : > { %s1027_s20 = smov (%p33_p0, %s31_s20), 0  ;;  %p54_p5 = scmp.eq.s32.totalorder %s597_s18, 0 }
   0xb   : > { %p872_p4 = por %p48_p2, %p47_p1  ;;  %s35_s23 = ssub.s32 %s799_s16, %s1027_s20 }
   0xc   : > { %p126_p6 = scmp.eq.s32.totalorder %s597_s18, 1  ;;  %p38_p7 = scmp.eq.s32.totalorder %s35_s23, 0 }
   0xd   : > { %p878_p8 = por %p54_p5, %p53_p3  ;;  %p132_p10 = scmp.eq.s32.totalorder %s598_s19, 1 }
   0xe   : > { %p882_p9 = por %p126_p6, %p47_p1  ;;  %p631_p13 = scmp.lt.s32.totalorder %s803_s17, 2 }
   0xf   : > { %s887_s26 = scalar_select %p38_p7, %s791_s14, %s40_s21  }
  0x10   : > { %p889_p11 = por %p132_p10, %p53_p3  ;;  %s155_s28 = sand.u32 1, %s791_s14  }
  0x11   : > { %s601_s29 = sshll.u32 %s155_s28, 3  ;;  %s614_s30 = sshll.u32 %s799_s16, 7 }
  0x12   : > { %s1015_s27 = scalar_select %p889_p11, 1, 0 }
  0x13   : > { %s167_s6 = scalar_lea.hbm %s1008_s0, %s614_s30  ;;  %s159_s7 = scalar_lea.vmem [#allocation3], %s601_s29 }
  0x14   : > { %s169_s8 = sshll.u32 %s159_s7, 4  ;;  %p902_p0 = pnand %p631_p13, %p872_p4  ;;  %s170_s8 = int_to_ptr.vmem [resolvable:$true] %s169_s8 }
  0x15   : > { %p604_p1 = scmp.ge.s32.totalorder %s803_s17, 1  ;;  %p186_p2 = scmp.lt.s32.totalorder %s803_s17, 3 }
  0x16   : > { %s156_s10 = scalar_lea.sflag [#allocation4], %s155_s28  ;;  %p697_p3 = pneg %p902_p0 }
  0x17   : > { %s708_s11 = scalar_lea.vmem %s170_s8, 128  ;;  %s805_s18 = smov [#allocation3]  }
  0x18   : > { %p709_p5 = scmp.ne.s32.totalorder %s170_s8, %s708_s11  ;;  %s713_s19 = sshll.u32 %s805_s18, 4  ;;  %s714_s19 = int_to_ptr.vmem [resolvable:$false] %s713_s19 }
  0x19   : > { %s715_s21 = scalar_lea.vmem %s714_s19, 256  ;;  %p716_p10 = scmp.lt.s32.totalorder %s170_s8, %s714_s19 }
  0x1a   : > { %p711_p6 = pnand %p709_p5, %p697_p3  ;;  %p717_p12 = scmp.lt.s32.totalorder %s715_s21, %s708_s11 }
  0x1c   : > { %p712_p7 = pneg %p711_p6  ;;  %p718_p4 = por %p717_p12, %p716_p10 }
  0x1e   : > { %p719_p13 = pnand %p718_p4, %p712_p7 }
  0x20   : > { %722 = shalt.err (!%p719_p13)
}
  0x21   : > { %626 = dma.hbm_to_vmem [thread:$0]  (!%p902_p0), %s167_s6, 128, %s170_s8, %s156_s10  }
  0x22   : > { %p187_p11 = pnand %p604_p1, %p186_p2 }
  0x23   : > { %s917_s22 = sand.u32 (!%p187_p11), 1, %s787_s13  }
  0x24   : > { %190 = sbr.rel (%p187_p11) target bundleno = 414 (0x19e), region = 32  ;;  %s605_s23 = sshll.u32 (!%p187_p11), %s917_s22, 3 }
  0x25   : > { %s193_s28 = scalar_lea.sflag (!%p187_p11), [#allocation4], %s917_s22  ;;  %s196_s29 = scalar_lea.vmem (!%p187_p11), [#allocation3], %s605_s23 }
  0x29   : > { %774 = dma.done.wait (%p878_p8), %s193_s28, 128  }
  0x2a   : > { %776 = vsyncadd (%p878_p8), %s193_s28, 4294967168  ;;  %v806_v0 = vmov 0   ;;  %vm278_vm0 = vcmask 1043456   ;;  %v382_v1 = vld [vmem:[%s1010_s2] sm:$0xf]  ;;  %p228_p8 = scmp.lt.s32.totalorder %s795_s15, 1  ;;  %v247_v22 = vlaneseq }
  0x2b   : > { %685 = vset.pattern.permute.xlu0 %v806_v0  ;;  %v244_v2 = vld [vmem:[%s196_s29] sm:$0xff]  ;;  %v807_v40 = vmov 0.0   ;;  %v808_v61 = vmov 1966171168   ;;  %vm437_vm6 = vcmask 1040384   ;;  %s611_s9 = sshll.u32 %s795_s15, 4 }
  0x2c   : > { %385 = vperm.xlu0 %685, %v382_v1   ;;  %v276_v3 = vcombine.high %v244_v2, %v244_v2  ;;  %v279_v4 = vsel %vm278_vm0, %v244_v2, -inf  ;;  %s229_s24 = scalar_select %p228_p8, %s795_s15, 1  ;;  %v263_v26 = vshrl.u32 %v247_v22, 7  ;;  %v260_v62 = vunpack.c.l.s4 %v808_v61 }
  0x2d   : > { %v280_v5 = vrot.slane %v279_v4, 4  ;;  %s225_s11 = scalar_lea.vmem [#allocation6], %s917_s22  ;;  %s966_s28 = scalar_lea.hbm %s1011_s3, %s611_s9 }
  0x2e   : > { %v286_v6 = vsel %vm278_vm0, %v276_v3, -inf  ;;  %s606_s5 = sshll.u32 %s229_s24, 1  ;;  %v938_v29 = vsub.s32 0, %v263_v26  ;;  %v940_v30 = vsub.s32 1, %v263_v26  ;;  %s505_s18 = sshll.u32 %s225_s11, 4  ;;  %s506_s18 = int_to_ptr.vmem [resolvable:$true] %s505_s18 }
  0x2f   : > { %v281_v7 = vmax.f32 %v279_v4, %v280_v5  ;;  %v287_v8 = vrot.slane %v286_v6, 4  ;;  %s234_s8 = scalar_lea.vmem %s1009_s1, %s606_s5  ;;  %s493_s29 = scalar_lea.sflag [#allocation5], %s917_s22 }
  0x30   : > { %v245_v32 = vld [vmem:[%s234_s8] sm:$0x3]  ;;  %s723_s15 = scalar_lea.vmem %s506_s18, 16  ;;  %s810_s30 = smov [#allocation6]  }
  0x31   : > { %v282_v9 = vrot.slane %v281_v7, 2  ;;  %v288_v10 = vmax.f32 %v286_v6, %v287_v8  ;;  %v328_v35 = vrot.slane %v245_v32, %v938_v29  ;;  %v332_v36 = vrot.slane %v245_v32, %v940_v30  ;;  %p724_p11 = scmp.ne.s32.totalorder %s506_s18, %s723_s15  ;;  %s727_s4 = sshll.u32 %s810_s30, 4  ;;  %s728_s4 = int_to_ptr.vmem [resolvable:$false] %s727_s4 }
  0x32   : > { %v809_v8 = vmov 1   ;;  %vm253_vm3 = vcmp.ne.s32.totalorder %v245_v32, 4294967196  ;;  %s729_s24 = scalar_lea.vmem %s728_s4, 32  ;;  %p730_p1 = scmp.lt.s32.totalorder %s506_s18, %s728_s4 }
  0x33   : > { %v283_v11 = vmax.f32 %v281_v7, %v282_v9  ;;  %v289_v12 = vrot.slane %v288_v10, 2  ;;  %vm333_vm1 = vcmp.eq.s32.totalorder %v263_v26, %v328_v35  ;;  %vm334_vm2 = vcmp.eq.s32.totalorder %v263_v26, %v332_v36  ;;  %p725_p12 = pnand %p724_p11, %p882_p9  ;;  %p731_p2 = scmp.lt.s32.totalorder %s729_s24, %s723_s15 }
  0x34   : > { %v607_v41 = vsel %vm333_vm1, 1.0, %v807_v40  ;;  %v608_v42 = vsel %vm334_vm2, 1.0, %v807_v40  ;;  %v258_v9 = vcombine.low %v809_v8, %v809_v8 }
  0x35   : > { %v284_v13 = vrot.slane %v283_v11, 1  ;;  %v290_v14 = vmax.f32 %v288_v10, %v289_v12  ;;  %v339_v45 = vmul.f32 %v607_v41, %v244_v2  ;;  %v340_v46 = vmul.f32 %v608_v42, %v276_v3  ;;  %p726_p0 = pneg %p725_p12  ;;  %p732_p3 = por %p731_p2, %p730_p1 }
  0x36   : > { %v261_v3 = vunpack.c.0.s8 %v260_v62 }
  0x37   : > { %v285_v15 = vmax.f32 %v283_v11, %v284_v13  ;;  %v291_v16 = vrot.slane %v290_v14, 1  ;;  %v341_v49 = vsel %vm278_vm0, %v339_v45, 0.0  ;;  %v348_v50 = vsel %vm278_vm0, %v340_v46, 0.0  ;;  %p733_p5 = pnand %p732_p3, %p726_p0 }
  0x38   : > { %v342_v51 = vrot.slane %v341_v49, 4  ;;  %v349_v52 = vrot.slane %v348_v50, 4  ;;  %v264_v10 = vsub.s32 %v261_v3, %v263_v26 }
  0x39   : > { %v292_v17 = vmax.f32 %v290_v14, %v291_v16 }
  0x3a   : > { %v343_v53 = vadd.f32 %v342_v51, %v341_v49  ;;  %v350_v54 = vadd.f32 %v349_v52, %v348_v50  ;;  %v265_v13 = vrot.slane %v258_v9, %v264_v10 }
  0x3b   : > { %v295_v18 = vcombine.low %v285_v15, %v292_v17 }
  0x3c   : > { %v344_v55 = vrot.slane %v343_v53, 2  ;;  %v351_v56 = vrot.slane %v350_v54, 2  ;;  %v272_v16 = vrot.slane %v265_v13, %v264_v10 }
  0x3d   : > { %v297_v19 = vsub.f32 %v244_v2, %v295_v18 }
  0x3e   : > { %v345_v58 = vadd.f32 %v344_v55, %v343_v53  ;;  %v352_v59 = vadd.f32 %v351_v56, %v350_v54  ;;  %vm273_vm4 = vcmp.ne.s32.totalorder %v272_v16, 0 }
  0x3f   : > { %v298_v20 = vmul.f32 1.442695, %v297_v19  ;;  %vm946_vm5 = vmand %vm253_vm3, %vm273_vm4 }
  0x40   : > { %v346_v1 = vrot.slane %v345_v58, 1  ;;  %v353_v2 = vrot.slane %v352_v59, 1 }
  0x41   : > { %687 = vpow2.f32 %v298_v20 }
  0x42   : > { %v347_v6 = vadd.f32 %v346_v1, %v345_v58  ;;  %v354_v7 = vadd.f32 %v353_v2, %v352_v59 }
  0x4e   : > { %v688_v21 = vpop.eup %687 }
  0x4f   : > { %v301_v23 = vcombine.high %v688_v21, %v688_v21  ;;  %v303_v24 = vsel %vm278_vm0, %v688_v21, 0.0 }
  0x50   : > { %v304_v27 = vrot.slane %v303_v24, 4 }
  0x51   : > { %v310_v25 = vsel %vm278_vm0, %v301_v23, 0.0 }
  0x52   : > { %v311_v28 = vrot.slane %v310_v25, 4  ;;  %v305_v31 = vadd.f32 %v304_v27, %v303_v24 }
  0x54   : > { %v312_v33 = vadd.f32 %v311_v28, %v310_v25  ;;  %v306_v34 = vrot.slane %v305_v31, 2 }
  0x56   : > { %v313_v37 = vrot.slane %v312_v33, 2  ;;  %v307_v38 = vadd.f32 %v306_v34, %v305_v31 }
  0x58   : > { %v314_v39 = vadd.f32 %v313_v37, %v312_v33  ;;  %v308_v43 = vrot.slane %v307_v38, 1 }
  0x5a   : > { %v315_v44 = vrot.slane %v314_v39, 1  ;;  %v309_v47 = vadd.f32 %v308_v43, %v307_v38 }
  0x5c   : > { %v316_v48 = vadd.f32 %v315_v44, %v314_v39  ;;  %689 = vlog2.f32 %v309_v47 }
  0x5e   : > { %691 = vlog2.f32 %v316_v48 }
  0x69   : > { %v690_v57 = vpop.eup %689 }
  0x6a   : > { %v318_v63 = vmul.f32 0.6931472, %v690_v57 }
  0x6b   : > { %v692_v60 = vpop.eup %691 }
  0x6c   : > { %v320_v0 = vmul.f32 0.6931472, %v692_v60  ;;  %v321_v4 = vadd.f32 %v318_v63, %v285_v15 }
  0x6e   : > { %v322_v5 = vadd.f32 %v320_v0, %v292_v17  ;;  %v355_v11 = vsub.f32 %v321_v4, %v347_v6 }
  0x70   : > { %v356_v12 = vsub.f32 %v322_v5, %v354_v7 }
  0x72   : > { %v359_v14 = vcombine.low %v355_v11, %v356_v12 }
  0x74   : > { %v366_v18 = vrot.slane %v359_v14, %v264_v10 }
  0x76   : > { %v373_v19 = vrot.slane %v366_v18, %v264_v10 }
  0x78   : > { %v375_v15 = vsel %vm946_vm5, %v373_v19, 0.0 }
  0x79   : > { %v376_v17 = vmax.f32 %v375_v15, 0.0 }
  0x7b   : > { %v377_v21 = vsub.f32 0.0, %v376_v17 }
  0x7d   : > { %v378_v23 = vmul.f32 1.442695, %v377_v21 }
  0x7f   : > { %693 = vpow2.f32 %v378_v23 }
  0x8c   : > { %v694_v35 = vpop.eup %693 }
  0x8d   : > { %v380_v40 = vsub.f32 1.0, %v694_v35 }
  0xa7   : > { %v386_v24 = vpop.permute.xlu0 %385 }
  0xa8   : > { %v388_v25 = vmul.f32 %v607_v41, %v386_v24  ;;  %v389_v26 = vmul.f32 %v608_v42, %v386_v24  ;;  %v381_v41 = vmul.f32 %v380_v40, %v380_v40 }
  0xaa   : > { %v390_v27 = vsel %vm278_vm0, %v388_v25, 0.0  ;;  %v397_v28 = vsel %vm278_vm0, %v389_v26, 0.0  ;;  %v424_v48 = vmul.f32 %v381_v41, %v376_v17 }
  0xab   : > { %v391_v31 = vrot.slane %v390_v27, 4  ;;  %v398_v32 = vrot.slane %v397_v28, 4 }
  0xad   : > { %v392_v33 = vadd.f32 %v391_v31, %v390_v27  ;;  %v399_v34 = vadd.f32 %v398_v32, %v397_v28 }
  0xaf   : > { %v393_v36 = vrot.slane %v392_v33, 2  ;;  %v400_v37 = vrot.slane %v399_v34, 2 }
  0xb1   : > { %v394_v38 = vadd.f32 %v393_v36, %v392_v33  ;;  %v401_v39 = vadd.f32 %v400_v37, %v399_v34 }
  0xb3   : > { %v395_v43 = vrot.slane %v394_v38, 1  ;;  %v402_v44 = vrot.slane %v401_v39, 1 }
  0xb5   : > { %v396_v45 = vadd.f32 %v395_v43, %v394_v38  ;;  %v403_v46 = vadd.f32 %v402_v44, %v401_v39 }
  0xb7   : > { %v406_v42 = vcombine.low %v396_v45, %v403_v46 }
  0xb9   : > { %v413_v47 = vrot.slane %v406_v42, %v264_v10 }
  0xbb   : > { %v420_v49 = vrot.slane %v413_v47, %v264_v10  ;;  %v248_v10 = vand.u32 127, %v247_v22 }
  0xbd   : > { %v422_v50 = vsel %vm946_vm5, %v420_v49, 0.0  ;;  %vm485_vm7 = vcmp.eq.s32.totalorder %v248_v10, 1  ;;  %vm483_vm8 = vcmp.eq.s32.totalorder %v248_v10, 0 }
  0xbe   : > { %v458_v51 = vrot.slane %v422_v50, %v938_v29  ;;  %v462_v52 = vrot.slane %v422_v50, %v940_v30  ;;  %v425_v53 = vmul.f32 %v424_v48, %v422_v50 }
  0xc0   : > { %v465_v54 = vsel %vm437_vm6, %v458_v51, 0.0  ;;  %v466_v55 = vsel %vm437_vm6, %v462_v52, 0.0  ;;  %v430_v56 = vrot.slane %v425_v53, %v938_v29  ;;  %v434_v57 = vrot.slane %v425_v53, %v940_v30 }
  0xc1   : > { %v467_v58 = vadd.f32 %v466_v55, %v465_v54 }
  0xc2   : > { %v438_v59 = vsel %vm437_vm6, %v430_v56, 0.0  ;;  %v439_v60 = vsel %vm437_vm6, %v434_v57, 0.0 }
  0xc3   : > { %468 = vadd.xlane.f32.xlu1 %v467_v58  ;;  %v440_v61 = vadd.f32 %v439_v60, %v438_v59 }
  0xc5   : > { %441 = vadd.xlane.f32.xlu0 %v440_v61 }
 0x14c   : > { %v469_v62 = vpop.xlane.xlu1 %468 }
 0x14d   : > { %v470_v63 = vrot.slane %v469_v62, 4 }
 0x14e   : > { %v442_v0 = vpop.xlane.xlu0 %441 }
 0x14f   : > { %v471_v1 = vadd.f32 %v470_v63, %v469_v62  ;;  %v443_v2 = vrot.slane %v442_v0, 4 }
 0x151   : > { %v472_v3 = vrot.slane %v471_v1, 2  ;;  %v444_v4 = vadd.f32 %v443_v2, %v442_v0 }
 0x153   : > { %v473_v5 = vadd.f32 %v472_v3, %v471_v1  ;;  %v445_v6 = vrot.slane %v444_v4, 2 }
 0x155   : > { %v446_v29 = vadd.f32 %v445_v6, %v444_v4  ;;  %v474_v7 = vrot.slane %v473_v5, 1 }
 0x157   : > { %v447_v30 = vrot.slane %v446_v29, 1  ;;  %v475_v9 = vadd.f32 %v474_v7, %v473_v5 }
 0x159   : > { %v448_v8 = vadd.f32 %v447_v30, %v446_v29 }
 0x15b   : > { %615 = vpush %v448_v8 }
 0x15c   : > { %617 = vpush %v475_v9 }
 0x18c   : > { %s616_s10 = spop %615 }
 0x18d   : > { %v489_v11 = vstv %s616_s10  ;;  %s618_s19 = spop %617 }
 0x18e   : > { %v487_v12 = vstv %s618_s19 }
 0x18f   : > { %v488_v13 = vsel %vm485_vm7, %v487_v12, 0.0 }
 0x190   : > { %v490_v14 = vsel %vm483_vm8, %v489_v11, %v488_v13 }
 0x191   : > { %491 = vst [vmem:[%s225_s11] sm:$0x1] %v490_v14 }
 0x192   : > { %736 = shalt.err (!%p733_p5)
}
 0x193   : > { %s737_s5 = scalar_lea.hbm %s966_s28, 16  ;;  %s741_s7 = scalar_lea.hbm %s1011_s3, 32 }
 0x194   : > { %p738_p6 = scmp.ne.s32.totalorder %s966_s28, %s737_s5  ;;  %p742_p4 = scmp.lt.s32.totalorder %s966_s28, %s1011_s3 }
 0x195   : > { %p743_p13 = scmp.lt.s32.totalorder %s741_s7, %s737_s5 }
 0x196   : > { %p739_p7 = pnand %p738_p6, %p882_p9 }
 0x197   : > { %p744_p8 = por %p743_p13, %p742_p4 }
 0x198   : > { %p740_p10 = pneg %p739_p7 }
 0x19a   : > { %p745_p11 = pnand %p744_p8, %p740_p10 }
 0x19c   : > { %748 = shalt.err (!%p745_p11)
}
 0x19d   : > { %621 = dma.vmem_to_hbm [thread:$0]  (%p882_p9), %s506_s18, 16, %s966_s28, %s493_s29  }
 0x19e PF: > { %s517_s10 = sand.u32 1, %s783_s12   ;;  %p1019_p12 = scmp.ne.s32.totalorder %s1015_s27, 0 }
 0x19f   : > { %p1020_p0 = scmp.ge.s32.totalorder %s803_s17, 2  ;;  %s518_s11 = scalar_lea.sflag [#allocation5], %s517_s10 }
 0x1a1   : > { %p628_p1 = pnand %p1020_p0, %p1019_p12 }
 0x1a3   : > { %p629_p2 = pneg %p628_p1 }
 0x1a5   : > { %778 = dma.done.wait (%p629_p2), %s518_s11, 16  }
 0x1a6   : > { %780 = vsyncadd (%p629_p2), %s518_s11, 4294967280  ;;  %s19_s17 = sadd.s32 1, %s803_s17   ;;  %s1021_s12 = smov %s787_s13 }
 0x1a7   : > { %p16_p3 = scmp.ge.s32.totalorder %s19_s17, 4   ;;  %s1022_s13 = smov %s791_s14 }
 0x1a8   : > { %s1023_s14 = smov %s887_s26  ;;  %s1024_s15 = smov %s799_s16 }
 0x1a9   : > { %s1025_s16 = smov %s1027_s20  ;;  %18 = sbr.rel (!%p16_p3) target bundleno = 6 (0x6), region = 92 }
 0x1ae   :  { %522 = vsyncpa [#allocation4], 1 }
 0x1af   :  { %524 = vsyncpa [#allocation4 + $0x1], 1 }
 0x1b0   :  { %525 = vsyncpa [#allocation5], 1 }
 0x1b1   :  { %527 = vsyncpa [#allocation5 + $0x1], 1 }

</bundles_post_ra>
